<compile_context>
chip_gen: v6e
topology: v6e:2x2x1
jax: 0.10.0
libtpu: 0.0.40
codegen_flags: <defaults>
</compile_context>

<pallas_src>
import functools

import jax
import jax.numpy as jnp
from jax.experimental import pallas as pl
from jax.experimental.pallas import tpu as pltpu

EPS = 1e-8  # matches torch.cosine_similarity eps


def _center_loss_kernel(x_ref, cen_ref, pidx_ref, nidx_ref, out_ref,
                        nor_sum_ref, pos_acc_ref, neg_acc_ref,
                        *, n_nor, n_pairs, tile_rows, alpha, beta, margin):
    """Row-tiled fused kernel.

    x_ref       : (TR, D)  tile of all feature rows (normal rows first)
    cen_ref     : (D, 1)   center vector (column layout, MXU-ready)
    pidx_ref    : (1, M)   global row index of each positive (ANF) snippet
    nidx_ref    : (1, M)   global row index of each negative (AAF) snippet
    out_ref     : (1, 1)   total loss (written on the last grid step)
    nor_sum_ref : (1, 1)   running sum of cos over normal rows      (scratch)
    pos_acc_ref : (1, M)   cos values picked at pidx                (scratch)
    neg_acc_ref : (1, M)   cos values picked at nidx                (scratch)
    """
    i = pl.program_id(0)

    @pl.when(i == 0)
    def _init():
        nor_sum_ref[...] = jnp.zeros_like(nor_sum_ref)
        pos_acc_ref[...] = jnp.zeros_like(pos_acc_ref)
        neg_acc_ref[...] = jnp.zeros_like(neg_acc_ref)

    x = x_ref[...].astype(jnp.float32)            # (TR, D)
    c = cen_ref[...].astype(jnp.float32)          # (D, 1)
    tr, d = x.shape

    # Center inverse norm (tiny; recomputed per tile, negligible).
    inv_c = jax.lax.rsqrt(jnp.maximum(jnp.sum(c * c), EPS * EPS))

    # D-contractions on the MXU (VALU only does the x*x square).
    dots = jnp.dot(x, c, preferred_element_type=jnp.float32)         # (TR, 1)
    ones = jnp.ones((d, 1), dtype=jnp.float32)
    sumsq = jnp.dot(x * x, ones, preferred_element_type=jnp.float32)  # (TR, 1)

    # cos(x, c) with torch-style eps clamping: max(||x||, eps) == sqrt(max(sumsq, eps^2))
    inv_x = jax.lax.rsqrt(jnp.maximum(sumsq, EPS * EPS))              # (TR, 1)
    cos = dots * inv_x * inv_c                                        # (TR, 1)

    # Global row id of each row in this tile.
    rid = jax.lax.broadcasted_iota(jnp.int32, (tr, 1), 0) + i * tile_rows

    # loss1 partial: sum of cos over the normal rows (rid < n_nor).
    nor_sum_ref[...] += jnp.sum(jnp.where(rid < n_nor, cos, 0.0))

    # loss2 partials: one-hot pick of cos at the selected abnormal rows.
    pos_match = rid == pidx_ref[...]                                  # (TR, M)
    neg_match = rid == nidx_ref[...]                                  # (TR, M)
    pos_acc_ref[...] += jnp.sum(jnp.where(pos_match, cos, 0.0), axis=0, keepdims=True)
    neg_acc_ref[...] += jnp.sum(jnp.where(neg_match, cos, 0.0), axis=0, keepdims=True)

    @pl.when(i == pl.num_programs(0) - 1)
    def _finalize():
        loss1 = 1.0 - nor_sum_ref[...] / n_nor                        # (1, 1)
        # cosdis(a,b) = (1 - cos)/2  =>  d_pos - d_neg = 0.5*(cos_neg - cos_pos)
        hinge = jnp.maximum(0.5 * (neg_acc_ref[...] - pos_acc_ref[...]) + margin, 0.0)
        loss2 = jnp.sum(hinge) / n_pairs
        out_ref[...] = (alpha * loss1 + beta * loss2).astype(jnp.float32)


def _row_tile(n_rows, max_rows=512):
    """Largest multiple-of-8 divisor of n_rows that is <= max_rows (else n_rows)."""
    if n_rows <= max_rows:
        return n_rows
    t = (max_rows // 8) * 8
    while t >= 8:
        if n_rows % t == 0:
            return t
        t -= 8
    return n_rows


def center_loss_forward(feat, score, centers, *, alpha=0.001, beta=0.5, margin=1.0, k=6):
    """Pallas implementation of CenterLoss.forward(feat, score)."""
    B, T, D = feat.shape
    assert D == centers.shape[-1]
    assert B % 2 == 0 and T >= k
    half = B // 2
    rows = B * T
    n_nor = half * T
    m = half * k

    # Normal rows occupy [0, n_nor), abnormal rows [n_nor, rows); reshape is free.
    feat_flat = feat.reshape(rows, D)
    abn_score = score[half:, :, 0]                          # (half, T)

    # TODO(synk): the top-k itself (data-dependent sort) stays in plain JAX;
    # only the tiny (1, half*k) int32 index vectors enter the kernel.
    neg_t = jax.lax.top_k(abn_score, k)[1]                  # largest scores  -> AAF (negatives)
    pos_t = jax.lax.top_k(-abn_score, k)[1]                 # smallest scores -> ANF (positives)
    vid_off = n_nor + jnp.arange(half, dtype=jnp.int32)[:, None] * T
    pos_idx = (vid_off + pos_t.astype(jnp.int32)).reshape(1, m)
    neg_idx = (vid_off + neg_t.astype(jnp.int32)).reshape(1, m)

    cen_col = centers.reshape(D, 1)

    tr = _row_tile(rows)
    grid = (rows // tr,)

    kernel = functools.partial(
        _center_loss_kernel,
        n_nor=n_nor, n_pairs=m, tile_rows=tr,
        alpha=float(alpha), beta=float(beta), margin=float(margin))

    out = pl.pallas_call(
        kernel,
        grid=grid,
        out_shape=jax.ShapeDtypeStruct((1, 1), jnp.float32),
        in_specs=[
            pl.BlockSpec((tr, D), lambda i: (i, 0)),        # feature rows: tiled & pipelined
            pl.BlockSpec((D, 1), lambda i: (0, 0)),         # center: resident
            pl.BlockSpec((1, m), lambda i: (0, 0)),         # ANF (positive) row indices
            pl.BlockSpec((1, m), lambda i: (0, 0)),         # AAF (negative) row indices
        ],
        out_specs=pl.BlockSpec((1, 1), lambda i: (0, 0)),
        scratch_shapes=[
            pltpu.VMEM((1, 1), jnp.float32),
            pltpu.VMEM((1, m), jnp.float32),
            pltpu.VMEM((1, m), jnp.float32),
        ],
        compiler_params=pltpu.CompilerParams(dimension_semantics=("arbitrary",)),
    )(feat_flat, cen_col, pos_idx, neg_idx)

    return out[0, 0]


def center_loss_reference(feat, score, centers, *, alpha=0.001, beta=0.5, margin=1.0, k=6):
    """Pure-JAX reference mirroring the PyTorch forward."""
    B, T, D = feat.shape
    half = B // 2

    def cossim(x, c):
        num = jnp.sum(x * c, axis=-1)
        den = jnp.maximum(jnp.linalg.norm(x, axis=-1), EPS) * jnp.maximum(jnp.linalg.norm(c), EPS)
        return num / den

    nor_feat = feat[:half].reshape(-1, D)
    abn_feat = feat[half:]
    abn_score = score[half:, :, 0]

    loss1 = 1.0 - jnp.mean(cossim(nor_feat, centers))

    top_idx = jax.lax.top_k(abn_score, k)[1]
    bot_idx = jax.lax.top_k(-abn_score, k)[1]
    aaf = jnp.take_along_axis(abn_feat, jnp.broadcast_to(top_idx[..., None], (half, k, D)), axis=1)
    anf = jnp.take_along_axis(abn_feat, jnp.broadcast_to(bot_idx[..., None], (half, k, D)), axis=1)

    d_pos = (1.0 - cossim(anf, centers)) / 2.0
    d_neg = (1.0 - cossim(aaf, centers)) / 2.0
    loss2 = jnp.mean(jnp.maximum(d_pos - d_neg + margin, 0.0))
    return alpha * loss1 + beta * loss2


if __name__ == "__main__":
    # Small shapes implied by the forward: feat (B, T, D), score (B, T, 1),
    # with B even and T >= 6 (top-k of 6 along time).
    B, T, D = 4, 16, 32
    key = jax.random.PRNGKey(0)
    k_feat, k_score, k_cen = jax.random.split(key, 3)

    feat = jax.random.normal(k_feat, (B, T, D), dtype=jnp.float32)
    score = jax.nn.sigmoid(jax.random.normal(k_score, (B, T, 1), dtype=jnp.float32))
    # nn.Parameter(torch.randn(feat_dim)) -> deterministic synthetic init here.
    centers = jax.random.normal(k_cen, (D,), dtype=jnp.float32)

    loss = jax.block_until_ready(center_loss_forward(feat, score, centers))
    ref = jax.block_until_ready(center_loss_reference(feat, score, centers))

    assert jnp.allclose(loss, ref, rtol=2e-3, atol=5e-4), (loss, ref)

    print("KERNEL_OK")
</pallas_src>

<mosaic_0001>
module attributes {stable_mosaic.version = 11 : i64} {
  func.func @_center_loss_kernel(%arg0: i32, %arg1: memref<64x32xf32, #tpu.memory_space<vmem>>, %arg2: memref<32x1xf32, #tpu.memory_space<vmem>>, %arg3: memref<1x12xi32, #tpu.memory_space<vmem>>, %arg4: memref<1x12xi32, #tpu.memory_space<vmem>>, %arg5: memref<1x1xf32, #tpu.memory_space<vmem>>, %arg6: memref<1x1xf32, #tpu.memory_space<vmem>>, %arg7: memref<1x12xf32, #tpu.memory_space<vmem>>, %arg8: memref<1x12xf32, #tpu.memory_space<vmem>>) attributes {dimension_semantics = [#tpu.dimension_semantics<arbitrary>], iteration_bounds = array<i64: 1>, scalar_prefetch = 0 : i64, scratch_operands = 3 : i64, tpu.core_type = #tpu.core_type<tc>, window_params = [{transform_indices = @transform_0, window_bounds = array<i64: 64, 32>}, {pipeline_mode = #tpu.pipeline_mode<synchronous>, transform_indices = @transform_1, window_bounds = array<i64: 32, 1>}, {pipeline_mode = #tpu.pipeline_mode<synchronous>, transform_indices = @transform_2, window_bounds = array<i64: 1, 12>}, {pipeline_mode = #tpu.pipeline_mode<synchronous>, transform_indices = @transform_3, window_bounds = array<i64: 1, 12>}, {pipeline_mode = #tpu.pipeline_mode<synchronous>, transform_indices = @transform_4, window_bounds = array<i64: 1, 1>}]} {
    %c0_i32 = arith.constant 0 : i32
    %0 = arith.cmpi eq, %arg0, %c0_i32 : i32
    %1 = arith.extui %0 : i1 to i32
    %c0_i32_0 = arith.constant 0 : i32
    %2 = arith.cmpi ne, %1, %c0_i32_0 : i32
    scf.if %2 {
      %cst_33 = arith.constant 0.000000e+00 : f32
      %67 = vector.broadcast %cst_33 : f32 to vector<1x1xf32>
      %c0_34 = arith.constant 0 : index
      %c0_35 = arith.constant 0 : index
      %68 = vector.load %arg6[%c0_34, %c0_35] : memref<1x1xf32, #tpu.memory_space<vmem>>, vector<1x1xf32>
      tpu.vector_store %arg6[%c0_34, %c0_35], %67 {strides = array<i32>} : memref<1x1xf32, #tpu.memory_space<vmem>>, vector<1x1xf32>,
      %cst_36 = arith.constant 0.000000e+00 : f32
      %69 = vector.broadcast %cst_36 : f32 to vector<1x12xf32>
      %c0_37 = arith.constant 0 : index
      %c0_38 = arith.constant 0 : index
      %70 = vector.load %arg7[%c0_37, %c0_38] : memref<1x12xf32, #tpu.memory_space<vmem>>, vector<1x12xf32>
      tpu.vector_store %arg7[%c0_37, %c0_38], %69 {strides = array<i32>} : memref<1x12xf32, #tpu.memory_space<vmem>>, vector<1x12xf32>,
      %cst_39 = arith.constant 0.000000e+00 : f32
      %71 = vector.broadcast %cst_39 : f32 to vector<1x12xf32>
      %c0_40 = arith.constant 0 : index
      %c0_41 = arith.constant 0 : index
      %72 = vector.load %arg8[%c0_40, %c0_41] : memref<1x12xf32, #tpu.memory_space<vmem>>, vector<1x12xf32>
      tpu.vector_store %arg8[%c0_40, %c0_41], %71 {strides = array<i32>} : memref<1x12xf32, #tpu.memory_space<vmem>>, vector<1x12xf32>,
    } else {
    }
    %c0 = arith.constant 0 : index
    %c0_1 = arith.constant 0 : index
    %3 = vector.load %arg1[%c0, %c0_1] : memref<64x32xf32, #tpu.memory_space<vmem>>, vector<64x32xf32>
    %c0_2 = arith.constant 0 : index
    %c0_3 = arith.constant 0 : index
    %4 = vector.load %arg2[%c0_2, %c0_3] : memref<32x1xf32, #tpu.memory_space<vmem>>, vector<32x1xf32>
    %5 = arith.mulf %4, %4 : vector<32x1xf32>
    %6 = vector.shape_cast %5 : vector<32x1xf32> to vector<1x32x1xf32>
    %cst = arith.constant dense<0.000000e+00> : vector<1xf32>
    %7 = vector.multi_reduction <add>, %6, %cst [1, 2] : vector<1x32x1xf32> to vector<1xf32>
    %8 = vector.shape_cast %7 : vector<1xf32> to vector<1x1x1xf32>
    %9 = vector.extract %8[0, 0, 0] : f32 from vector<1x1x1xf32>
    %cst_4 = arith.constant 1.000000e-16 : f32
    %10 = arith.maximumf %9, %cst_4 : f32
    %11 = math.rsqrt %10 : f32
    %cst_5 = arith.constant dense<0.000000e+00> : vector<64x1xf32>
    %12 = tpu.matmul %3, %4, %cst_5 {dimension_numbers = #tpu.dot_dimension_numbers<[1], [0], [0], [1], [0, 0, 1, 1], [], []>} : vector<64x32xf32>, vector<32x1xf32>, vector<64x1xf32> -> vector<64x1xf32>
    %cst_6 = arith.constant 1.000000e+00 : f32
    %13 = vector.broadcast %cst_6 : f32 to vector<32x1xf32>
    %14 = arith.mulf %3, %3 : vector<64x32xf32>
    %cst_7 = arith.constant dense<0.000000e+00> : vector<64x1xf32>
    %15 = tpu.matmul %14, %13, %cst_7 {dimension_numbers = #tpu.dot_dimension_numbers<[1], [0], [0], [1], [0, 0, 1, 1], [], []>} : vector<64x32xf32>, vector<32x1xf32>, vector<64x1xf32> -> vector<64x1xf32>
    %cst_8 = arith.constant 1.000000e-16 : f32
    %16 = vector.broadcast %cst_8 : f32 to vector<64x1xf32>
    %17 = arith.maximumf %15, %16 : vector<64x1xf32>
    %18 = math.rsqrt %17 : vector<64x1xf32>
    %19 = arith.mulf %12, %18 : vector<64x1xf32>
    %20 = vector.broadcast %11 : f32 to vector<64x1xf32>
    %21 = arith.mulf %19, %20 : vector<64x1xf32>
    %22 = tpu.iota {dimensions = array<i32: 0>} : vector<64x1xi32>
    %c64_i32 = arith.constant 64 : i32
    %23 = arith.muli %arg0, %c64_i32 : i32
    %24 = vector.broadcast %23 : i32 to vector<64x1xi32>
    %25 = arith.addi %22, %24 : vector<64x1xi32>
    %c0_9 = arith.constant 0 : index
    %c0_10 = arith.constant 0 : index
    %26 = vector.load %arg6[%c0_9, %c0_10] : memref<1x1xf32, #tpu.memory_space<vmem>>, vector<1x1xf32>
    %c32_i32 = arith.constant 32 : i32
    %27 = vector.broadcast %c32_i32 : i32 to vector<64x1xi32>
    %28 = arith.cmpi slt, %25, %27 : vector<64x1xi32>
    %cst_11 = arith.constant 0.000000e+00 : f32
    %29 = vector.broadcast %cst_11 : f32 to vector<64x1xf32>
    %30 = arith.select %28, %21, %29 : vector<64x1xi1>, vector<64x1xf32>
    %31 = vector.shape_cast %30 : vector<64x1xf32> to vector<1x64x1xf32>
    %cst_12 = arith.constant dense<0.000000e+00> : vector<1xf32>
    %32 = vector.multi_reduction <add>, %31, %cst_12 [1, 2] : vector<1x64x1xf32> to vector<1xf32>
    %33 = vector.shape_cast %32 : vector<1xf32> to vector<1x1x1xf32>
    %34 = vector.extract %33[0, 0, 0] : f32 from vector<1x1x1xf32>
    %35 = vector.broadcast %34 : f32 to vector<1x1xf32>
    %36 = arith.addf %26, %35 : vector<1x1xf32>
    %c0_13 = arith.constant 0 : index
    %c0_14 = arith.constant 0 : index
    %37 = vector.load %arg6[%c0_13, %c0_14] : memref<1x1xf32, #tpu.memory_space<vmem>>, vector<1x1xf32>
    tpu.vector_store %arg6[%c0_13, %c0_14], %36 {strides = array<i32>} : memref<1x1xf32, #tpu.memory_space<vmem>>, vector<1x1xf32>,
    %c0_15 = arith.constant 0 : index
    %c0_16 = arith.constant 0 : index
    %38 = vector.load %arg3[%c0_15, %c0_16] : memref<1x12xi32, #tpu.memory_space<vmem>>, vector<1x12xi32>
    %39 = vector.broadcast %25 : vector<64x1xi32> to vector<64x12xi32>
    %40 = vector.broadcast %38 : vector<1x12xi32> to vector<64x12xi32>
    %41 = arith.cmpi eq, %39, %40 : vector<64x12xi32>
    %c0_17 = arith.constant 0 : index
    %c0_18 = arith.constant 0 : index
    %42 = vector.load %arg4[%c0_17, %c0_18] : memref<1x12xi32, #tpu.memory_space<vmem>>, vector<1x12xi32>
    %43 = vector.broadcast %25 : vector<64x1xi32> to vector<64x12xi32>
    %44 = vector.broadcast %42 : vector<1x12xi32> to vector<64x12xi32>
    %45 = arith.cmpi eq, %43, %44 : vector<64x12xi32>
    %c0_19 = arith.constant 0 : index
    %c0_20 = arith.constant 0 : index
    %46 = vector.load %arg7[%c0_19, %c0_20] : memref<1x12xf32, #tpu.memory_space<vmem>>, vector<1x12xf32>
    %cst_21 = arith.constant 0.000000e+00 : f32
    %47 = vector.shape_cast %21 : vector<64x1xf32> to vector<64x1xf32>
    %48 = vector.broadcast %47 : vector<64x1xf32> to vector<64x12xf32>
    %49 = vector.broadcast %cst_21 : f32 to vector<64x12xf32>
    %50 = arith.select %41, %48, %49 : vector<64x12xi1>, vector<64x12xf32>
    %cst_22 = arith.constant dense<0.000000e+00> : vector<12xf32>
    %51 = vector.multi_reduction <add>, %50, %cst_22 [0] : vector<64x12xf32> to vector<12xf32>
    %52 = vector.shape_cast %51 : vector<12xf32> to vector<1x12xf32>
    %53 = arith.addf %46, %52 : vector<1x12xf32>
    %c0_23 = arith.constant 0 : index
    %c0_24 = arith.constant 0 : index
    %54 = vector.load %arg7[%c0_23, %c0_24] : memref<1x12xf32, #tpu.memory_space<vmem>>, vector<1x12xf32>
    tpu.vector_store %arg7[%c0_23, %c0_24], %53 {strides = array<i32>} : memref<1x12xf32, #tpu.memory_space<vmem>>, vector<1x12xf32>,
    %c0_25 = arith.constant 0 : index
    %c0_26 = arith.constant 0 : index
    %55 = vector.load %arg8[%c0_25, %c0_26] : memref<1x12xf32, #tpu.memory_space<vmem>>, vector<1x12xf32>
    %cst_27 = arith.constant 0.000000e+00 : f32
    %56 = vector.shape_cast %21 : vector<64x1xf32> to vector<64x1xf32>
    %57 = vector.broadcast %56 : vector<64x1xf32> to vector<64x12xf32>
    %58 = vector.broadcast %cst_27 : f32 to vector<64x12xf32>
    %59 = arith.select %45, %57, %58 : vector<64x12xi1>, vector<64x12xf32>
    %cst_28 = arith.constant dense<0.000000e+00> : vector<12xf32>
    %60 = vector.multi_reduction <add>, %59, %cst_28 [0] : vector<64x12xf32> to vector<12xf32>
    %61 = vector.shape_cast %60 : vector<12xf32> to vector<1x12xf32>
    %62 = arith.addf %55, %61 : vector<1x12xf32>
    %c0_29 = arith.constant 0 : index
    %c0_30 = arith.constant 0 : index
    %63 = vector.load %arg8[%c0_29, %c0_30] : memref<1x12xf32, #tpu.memory_space<vmem>>, vector<1x12xf32>
    tpu.vector_store %arg8[%c0_29, %c0_30], %62 {strides = array<i32>} : memref<1x12xf32, #tpu.memory_space<vmem>>, vector<1x12xf32>,
    %c0_i32_31 = arith.constant 0 : i32
    %64 = arith.cmpi eq, %arg0, %c0_i32_31 : i32
    %65 = arith.extui %64 : i1 to i32
    %c0_i32_32 = arith.constant 0 : i32
    %66 = arith.cmpi ne, %65, %c0_i32_32 : i32
    scf.if %66 {
      %c0_33 = arith.constant 0 : index
      %c0_34 = arith.constant 0 : index
      %67 = vector.load %arg6[%c0_33, %c0_34] : memref<1x1xf32, #tpu.memory_space<vmem>>, vector<1x1xf32>
      %cst_35 = arith.constant 3.200000e+01 : f32
      %68 = vector.broadcast %cst_35 : f32 to vector<1x1xf32>
      %69 = arith.divf %67, %68 : vector<1x1xf32>
      %cst_36 = arith.constant 1.000000e+00 : f32
      %70 = vector.broadcast %cst_36 : f32 to vector<1x1xf32>
      %71 = arith.subf %70, %69 : vector<1x1xf32>
      %c0_37 = arith.constant 0 : index
      %c0_38 = arith.constant 0 : index
      %72 = vector.load %arg8[%c0_37, %c0_38] : memref<1x12xf32, #tpu.memory_space<vmem>>, vector<1x12xf32>
      %c0_39 = arith.constant 0 : index
      %c0_40 = arith.constant 0 : index
      %73 = vector.load %arg7[%c0_39, %c0_40] : memref<1x12xf32, #tpu.memory_space<vmem>>, vector<1x12xf32>
      %74 = arith.subf %72, %73 : vector<1x12xf32>
      %cst_41 = arith.constant 5.000000e-01 : f32
      %75 = vector.broadcast %cst_41 : f32 to vector<1x12xf32>
      %76 = arith.mulf %75, %74 : vector<1x12xf32>
      %cst_42 = arith.constant 1.000000e+00 : f32
      %77 = vector.broadcast %cst_42 : f32 to vector<1x12xf32>
      %78 = arith.addf %76, %77 : vector<1x12xf32>
      %cst_43 = arith.constant 0.000000e+00 : f32
      %79 = vector.broadcast %cst_43 : f32 to vector<1x12xf32>
      %80 = arith.maximumf %78, %79 : vector<1x12xf32>
      %81 = vector.shape_cast %80 : vector<1x12xf32> to vector<1x1x12xf32>
      %cst_44 = arith.constant dense<0.000000e+00> : vector<1xf32>
      %82 = vector.multi_reduction <add>, %81, %cst_44 [1, 2] : vector<1x1x12xf32> to vector<1xf32>
      %83 = vector.shape_cast %82 : vector<1xf32> to vector<1x1x1xf32>
      %84 = vector.extract %83[0, 0, 0] : f32 from vector<1x1x1xf32>
      %cst_45 = arith.constant 1.200000e+01 : f32
      %85 = arith.divf %84, %cst_45 : f32
      %cst_46 = arith.constant 1.000000e-03 : f32
      %86 = vector.broadcast %cst_46 : f32 to vector<1x1xf32>
      %87 = arith.mulf %86, %71 : vector<1x1xf32>
      %cst_47 = arith.constant 5.000000e-01 : f32
      %88 = arith.mulf %cst_47, %85 : f32
      %89 = vector.broadcast %88 : f32 to vector<1x1xf32>
      %90 = arith.addf %87, %89 : vector<1x1xf32>
      %c0_48 = arith.constant 0 : index
      %c0_49 = arith.constant 0 : index
      %91 = vector.load %arg5[%c0_48, %c0_49] : memref<1x1xf32, #tpu.memory_space<vmem>>, vector<1x1xf32>
      tpu.vector_store %arg5[%c0_48, %c0_49], %90 {strides = array<i32>} : memref<1x1xf32, #tpu.memory_space<vmem>>, vector<1x1xf32>,
    } else {
    }
    return
  }
  func.func @transform_0(%arg0: i32) -> (i32, i32) {
    %c0_i32 = arith.constant 0 : i32
    %c0_i32_0 = arith.constant 0 : i32
    return %arg0, %c0_i32 : i32, i32
  }
  func.func @transform_1(%arg0: i32) -> (i32, i32) {
    %c0_i32 = arith.constant 0 : i32
    %c0_i32_0 = arith.constant 0 : i32
    %c0_i32_1 = arith.constant 0 : i32
    return %c0_i32, %c0_i32_0 : i32, i32
  }
  func.func @transform_2(%arg0: i32) -> (i32, i32) {
    %c0_i32 = arith.constant 0 : i32
    %c0_i32_0 = arith.constant 0 : i32
    %c0_i32_1 = arith.constant 0 : i32
    return %c0_i32, %c0_i32_0 : i32, i32
  }
  func.func @transform_3(%arg0: i32) -> (i32, i32) {
    %c0_i32 = arith.constant 0 : i32
    %c0_i32_0 = arith.constant 0 : i32
    %c0_i32_1 = arith.constant 0 : i32
    return %c0_i32, %c0_i32_0 : i32, i32
  }
  func.func @transform_4(%arg0: i32) -> (i32, i32) {
    %c0_i32 = arith.constant 0 : i32
    %c0_i32_0 = arith.constant 0 : i32
    %c0_i32_1 = arith.constant 0 : i32
    return %c0_i32, %c0_i32_0 : i32, i32
  }
}

</mosaic_0001>

<bundles_post_ra>
// kernel: tpu_custom_call.1
= control target key start
LH: loop header
LB: loop body
LE: loop exit
PB: predicated region body
PF: predicated region fallthrough
CT: control target
= control target key end

     0   :  { %vm43_vm0 = vcmask 7168   ;;  %v742_v7 = vmov 1.0   ;;  %vm64_vm1 = vcmask 261120   ;;  %s891_s0 = inlined_call_operand.vmem [shape: f32[64,32], index: 0, kind: input, shape index: {}]   ;;  %s892_s1 = inlined_call_operand.vmem [shape: f32[32,1], index: 1, kind: input, shape index: {}]   ;;  %s893_s2 = inlined_call_operand.vmem [shape: s32[1,12], index: 2, kind: input, shape index: {}]   ;;  %s894_s3 = inlined_call_operand.vmem [shape: s32[1,12], index: 3, kind: input, shape index: {}]   ;;  %s895_s4 = inlined_call_operand.hbm [shape: f32[1,1], index: 4, kind: output, shape index: {}]  }
   0x1   :  { %v35_v0 = vld [vmem:[%s892_s1] sm:$0xff]  ;;  %v36_v1 = vld [vmem:[%s892_s1 + $0x8] sm:$0xff]  ;;  %v37_v2 = vld [vmem:[%s892_s1 + $0x10] sm:$0xff]  ;;  %667 = vmatprep.subr.mxu1 %v742_v7 }
   0x2   :  { %v38_v3 = vld [vmem:[%s892_s1 + $0x18] sm:$0xff]  ;;  %v39_v4 = vmul.f32 %v35_v0, %v35_v0  ;;  %v40_v5 = vmul.f32 %v36_v1, %v36_v1  ;;  %v41_v6 = vmul.f32 %v37_v2, %v37_v2  ;;  %v27_v8 = vld [vmem:[%s891_s0] sm:$0xff]  ;;  %668 = vmatpush3.msra.mxu1 %v742_v7  ;;  %v28_v11 = vld [vmem:[%s891_s0 + $0x8] sm:$0xff] }
   0x3   :  { %v42_v9 = vmul.f32 %v38_v3, %v38_v3  ;;  %v194_v10 = vmul.f32 %v27_v8, %v27_v8  ;;  %647 = vmatprep.subr.mxu0 %v38_v3  ;;  %669 = vmatprep.subr.mxu1 %v742_v7  ;;  %v29_v15 = vld [vmem:[%s891_s0 + $0x10] sm:$0xff] }
   0x4   :  { %v44_v12 = vsel %vm43_vm0, %v39_v4, 0.0  ;;  %v45_v13 = vsel %vm43_vm0, %v40_v5, 0.0  ;;  %v47_v14 = vsel %vm43_vm0, %v41_v6, 0.0  ;;  %648 = vmatpush3.msra.mxu0 %v38_v3  ;;  %670 = vmatpush3.msra.mxu1 %v742_v7 }
   0x5   :  { %v46_v16 = vadd.f32 %v45_v13, %v44_v12  ;;  %675 = vmatprep.mubr.msk.f32.mxu1 %vm64_vm1, %v194_v10 }
   0x6   :  { %9 = vsyncpa [#allocation6], 0  ;;  %v49_v17 = vsel %vm43_vm0, %v42_v9, 0.0  ;;  %671 = vmatprep.subr.mxu1 %v742_v7  ;;  %v195_v18 = vmul.f32 %v28_v11, %v28_v11  ;;  %649 = vmatprep.subr.mxu0 %v37_v2  ;;  %v196_v20 = vmul.f32 %v29_v15, %v29_v15  ;;  %v30_v21 = vld [vmem:[%s891_s0 + $0x18] sm:$0xff]  ;;  %v31_v22 = vld [vmem:[%s891_s0 + $0x20] sm:$0xff]  ;;  %v743_v34 = vmov 0  }
   0x7   :  { %v48_v19 = vadd.f32 %v47_v14, %v46_v16  ;;  %672 = vmatpush3.msra.mxu1 %v742_v7  ;;  %650 = vmatpush3.msra.mxu0 %v37_v2  ;;  %v197_v24 = vmul.f32 %v30_v21, %v30_v21  ;;  %v198_v25 = vmul.f32 %v31_v22, %v31_v22  ;;  %v32_v26 = vld [vmem:[%s891_s0 + $0x28] sm:$0xff]  ;;  %v33_v27 = vld [vmem:[%s891_s0 + $0x30] sm:$0xff]  ;;  %v34_v30 = vld [vmem:[%s891_s0 + $0x38] sm:$0xff]  ;;  %s744_s12 = smov 1e-16   ;;  %vm24_vm2 = vcmask 90112  }
   0x8   :  { %673 = vmatprep.subr.mxu1 %v742_v7  ;;  %651 = vmatprep.subr.mxu0 %v36_v1  ;;  %v199_v28 = vmul.f32 %v32_v26, %v32_v26  ;;  %v200_v29 = vmul.f32 %v33_v27, %v33_v27  ;;  %v201_v31 = vmul.f32 %v34_v30, %v34_v30  ;;  %vm22_vm3 = vcmask 0   ;;  %s746_s21 = smov [#allocation5]  }
   0x9   :  { %v50_v23 = vadd.f32 %v49_v17, %v48_v19  ;;  %674 = vmatpush3.msra.mxu1 %v742_v7  ;;  %652 = vmatpush3.msra.mxu0 %v36_v1  ;;  %vm503_vm8 = vcmask 97280   ;;  %s597_s22 = sshll.u32 %s746_s21, 4  ;;  %s598_s22 = int_to_ptr.vmem [resolvable:$true] %s597_s22 }
   0xa   :  { %676 = vmatmul.mubr.msk.f32.vlgmr.msra.gmra.mxu1 %vm64_vm1, %v195_v18  ;;  %653 = vmatprep.subr.mxu0 %v35_v0  ;;  %s720_s23 = scalar_lea.vmem %s598_s22, 16  ;;  %s724_s24 = scalar_lea.vmem %s598_s22, 32 }
   0xb   :  { %51 = vadd.xlane.f32.xlu0 %v50_v23  ;;  %678 = vmatprep.mubr.msk.f32.mxu1 %vm64_vm1, %v196_v20  ;;  %p721_p0 = scmp.ne.s32.totalorder %s598_s22, %s720_s23  ;;  %p725_p1 = scmp.lt.s32.totalorder %s598_s22, %s598_s22 }
   0xc   :  { %654 = vmatpush3.msra.mxu0 %v35_v0  ;;  %655 = vmatprep.mubr.msk.f32.mxu0 %vm64_vm1, %v27_v8  ;;  %p726_p2 = scmp.lt.s32.totalorder %s724_s24, %s720_s23 }
   0xd   :  { %656 = vmatmul.mubr.msk.f32.vlgmr.msra.gmra.mxu0 %vm64_vm1, %v28_v11  ;;  %701 = vset.pattern.permute.xlu1 %v743_v34 }
   0xe   :  { %679 = vmatmul.mubr.msk.f32.gmra.mxu1 %vm64_vm1, %v197_v24  ;;  %658 = vmatprep.mubr.msk.f32.mxu0 %vm64_vm1, %v29_v15  ;;  %p727_p3 = por %p726_p2, %p725_p1 }
   0xf   :  { %681 = vmatprep.mubr.msk.f32.mxu1 %vm64_vm1, %v198_v25  ;;  %700 = vset.pattern.permute.xlu0 %v743_v34 }
  0x10   :  { %p728_p4 = pnand %p727_p3, %p721_p0 }
  0x11   :  { %659 = vmatmul.mubr.msk.f32.gmra.mxu0 %vm64_vm1, %v30_v21 }
  0x12   :  { %682 = vmatmul.mubr.msk.f32.gmra.mxu1 %vm64_vm1, %v199_v28  ;;  %661 = vmatprep.mubr.msk.f32.mxu0 %vm64_vm1, %v31_v22 }
  0x13   :  { %684 = vmatprep.mubr.msk.f32.mxu1 %vm64_vm1, %v200_v29 }
  0x15   :  { %662 = vmatmul.mubr.msk.f32.gmra.mxu0 %vm64_vm1, %v32_v26 }
  0x16   :  { %685 = vmatmul.mubr.msk.f32.gmra.mxu1 %vm64_vm1, %v201_v31  ;;  %664 = vmatprep.mubr.msk.f32.mxu0 %vm64_vm1, %v33_v27  ;;  %v745_v27 = vmov 0.0  }
  0x17   :  { %25 = vst.msk [vmem:[#allocation3] sm:$0x1] %vm24_vm2, %v745_v27  ;;  %26 = vst.msk [vmem:[#allocation4] sm:$0x1] %vm24_vm2, %v745_v27 }
  0x18   :  { %23 = vst.msk [vmem:[#allocation2] sm:$0x1] %vm22_vm3, %v745_v27 }
  0x19   :  { %665 = vmatmul.mubr.msk.f32.gmra.mxu0 %vm64_vm1, %v34_v30 }
  0x94   :  { %v52_v32 = vpop.xlane.xlu0 %51 }
  0x95   :  { %v53_v33 = vrot.slane %v52_v32, 4 }
  0x97   :  { %v54_v35 = vadd.f32 %v53_v33, %v52_v32 }
  0x99   :  { %v55_v36 = vrot.slane %v54_v35, 2 }
  0x9b   :  { %v56_v37 = vadd.f32 %v55_v36, %v54_v35  ;;  %v364_v35 = vlaneseq }
  0x9d   :  { %v57_v38 = vrot.slane %v56_v37, 1  ;;  %v365_v36 = vshrl.u32 %v364_v35, 7 }
  0x9f   :  { %v58_v39 = vadd.f32 %v57_v38, %v56_v37  ;;  %v366_v38 = vadd.s32 8, %v365_v36 }
  0xa1   :  { %687 = vpush %v58_v39  ;;  %v838_v39 = vld [vmem:[%s893_s2] ss:$0 sm:$0xff] }
  0xa2   :  { %vm434_vm4 = vcmp.eq.s32.totalorder %v366_v38, %v838_v39  ;;  %vm433_vm6 = vcmp.eq.s32.totalorder %v365_v36, %v838_v39 }
  0xca   :  { %v677_v42 = vpop.f32.mrf.mxu1 }
  0xcb   :  { %v332_v45 = vmax.f32 %v677_v42, 1e-16 }
  0xcc   :  { %v292_v43 = vpop.f32.mrf.mxu1 }
  0xcd   :  { %v331_v47 = vmax.f32 %v292_v43, 1e-16  ;;  %v657_v52 = vpop.f32.mrf.mxu0 }
  0xce   :  { %v680_v44 = vpop.f32.mrf.mxu1 }
  0xcf   :  { %v334_v50 = vmax.f32 %v680_v44, 1e-16  ;;  %v155_v55 = vpop.f32.mrf.mxu0  ;;  %v368_v44 = vadd.s32 24, %v365_v36 }
  0xd0   :  { %v302_v46 = vpop.f32.mrf.mxu1 }
  0xd1   :  { %v333_v48 = vmax.f32 %v302_v46, 1e-16  ;;  %v660_v58 = vpop.f32.mrf.mxu0  ;;  %vm436_vm11 = vcmp.eq.s32.totalorder %v368_v44, %v838_v39 }
  0xd2   :  { %s688_s0 = spop %687  ;;  %v683_v49 = vpop.f32.mrf.mxu1 }
  0xd3   :  { %s60_s13 = smax.f32 %s744_s12, %s688_s0  ;;  %v336_v56 = vmax.f32 %v683_v49, 1e-16  ;;  %v165_v63 = vpop.f32.mrf.mxu0 }
  0xd4   :  { %v61_v40 = vstv %s60_s13  ;;  %v312_v51 = vpop.f32.mrf.mxu1 }
  0xd5   :  { %702 = vrsqrt.f32 %v61_v40  ;;  %v335_v53 = vmax.f32 %v312_v51, 1e-16  ;;  %v663_v8 = vpop.f32.mrf.mxu0  ;;  %v843_v40 = vld [vmem:[%s894_s3] ss:$0 sm:$0xff]  ;;  %v370_v51 = vadd.s32 40, %v365_v36 }
  0xd6   :  { %704 = vrsqrt.f32 %v332_v45  ;;  %v686_v54 = vpop.f32.mrf.mxu1  ;;  %vm447_vm5 = vcmp.eq.s32.totalorder %v366_v38, %v843_v40  ;;  %vm446_vm7 = vcmp.eq.s32.totalorder %v365_v36, %v843_v40  ;;  %v369_v45 = vadd.s32 32, %v365_v36 }
  0xd7   :  { %706 = vrsqrt.f32 %v331_v47  ;;  %v338_v2 = vmax.f32 %v686_v54, 1e-16  ;;  %v175_v12 = vpop.f32.mrf.mxu0  ;;  %vm449_vm12 = vcmp.eq.s32.totalorder %v368_v44, %v843_v40  ;;  %v371_v54 = vadd.s32 48, %v365_v36 }
  0xd8   :  { %708 = vrsqrt.f32 %v333_v48  ;;  %v322_v57 = vpop.f32.mrf.mxu1  ;;  %vm437_vm13 = vcmp.eq.s32.totalorder %v369_v45, %v838_v39  ;;  %vm450_vm14 = vcmp.eq.s32.totalorder %v369_v45, %v843_v40  ;;  %vm438_vm15 = vcmp.eq.s32.totalorder %v370_v51, %v838_v39 }
  0xd9   :  { %710 = vrsqrt.f32 %v334_v50  ;;  %v337_v61 = vmax.f32 %v322_v57, 1e-16  ;;  %v666_v16 = vpop.f32.mrf.mxu0  ;;  %vm439_vm1 = vcmp.eq.s32.totalorder %v371_v54, %v838_v39 }
  0xda   :  { %712 = vrsqrt.f32 %v335_v53 }
  0xdb   :  { %714 = vrsqrt.f32 %v336_v56  ;;  %v185_v20 = vpop.f32.mrf.mxu0 }
  0xdc   :  { %716 = vrsqrt.f32 %v337_v61 }
  0xdd   :  { %718 = vrsqrt.f32 %v338_v2 }
  0xe2   :  { %v703_v41 = vpop.eup %702 }
  0xe3   :  { %689 = vpush %v703_v41  ;;  %v705_v59 = vpop.eup %704  ;;  %v367_v41 = vadd.s32 16, %v365_v36 }
  0xe4   :  { %v707_v60 = vpop.eup %706  ;;  %v348_v0 = vmul.f32 %v705_v59, %v657_v52 }
  0xe5   :  { %v709_v62 = vpop.eup %708  ;;  %v347_v1 = vmul.f32 %v707_v60, %v155_v55  ;;  %vm435_vm9 = vcmp.eq.s32.totalorder %v367_v41, %v838_v39  ;;  %vm448_vm10 = vcmp.eq.s32.totalorder %v367_v41, %v843_v40 }
  0xe6   :  { %v349_v4 = vmul.f32 %v709_v62, %v165_v63  ;;  %v711_v7 = vpop.eup %710 }
  0xe7   :  { %v350_v9 = vmul.f32 %v711_v7, %v660_v58  ;;  %v713_v11 = vpop.eup %712 }
  0xe8   :  { %v351_v13 = vmul.f32 %v713_v11, %v175_v12  ;;  %v715_v15 = vpop.eup %714 }
  0xe9   :  { %v352_v17 = vmul.f32 %v715_v15, %v663_v8  ;;  %v717_v19 = vpop.eup %716 }
  0xea   :  { %v353_v21 = vmul.f32 %v717_v19, %v185_v20  ;;  %v719_v23 = vpop.eup %718 }
  0xeb   :  { %v354_v24 = vmul.f32 %v719_v23, %v666_v16 }
 0x114   :  { %s690_s14 = spop %689 }
 0x115   :  { %v355_v3 = vstv %s690_s14 }
 0x116   :  { %v357_v5 = vmul.f32 %v355_v3, %v348_v0  ;;  %v356_v6 = vmul.f32 %v355_v3, %v347_v1  ;;  %v358_v10 = vmul.f32 %v355_v3, %v349_v4  ;;  %v359_v14 = vmul.f32 %v355_v3, %v350_v9 }
 0x117   :  { %v360_v18 = vmul.f32 %v355_v3, %v351_v13  ;;  %v361_v22 = vmul.f32 %v355_v3, %v352_v17  ;;  %v362_v25 = vmul.f32 %v355_v3, %v353_v21  ;;  %v363_v26 = vmul.f32 %v355_v3, %v354_v24 }
 0x118   :  { %462 = vperm.xlu1 %701, %v357_v5   ;;  %457 = vperm.xlu0 %700, %v356_v6   ;;  %v401_v28 = vsel %vm43_vm0, %v357_v5, 0.0  ;;  %v400_v29 = vsel %vm43_vm0, %v356_v6, 0.0  ;;  %v403_v31 = vsel %vm43_vm0, %v358_v10, 0.0  ;;  %v405_v33 = vsel %vm43_vm0, %v359_v14, 0.0 }
 0x119   :  { %v402_v30 = vadd.f32 %v401_v28, %v400_v29  ;;  %vm451_vm0 = vcmp.eq.s32.totalorder %v370_v51, %v843_v40  ;;  %v372_v13 = vadd.s32 56, %v365_v36 }
 0x11b   :  { %v404_v32 = vadd.f32 %v403_v31, %v402_v30 }
 0x11c   :  { %467 = vperm.xlu1 %701, %v358_v10  }
 0x11d   :  { %v406_v34 = vadd.f32 %v405_v33, %v404_v32 }
 0x120   :  { %472 = vperm.xlu1 %701, %v359_v14  }
 0x124   :  { %477 = vperm.xlu1 %701, %v360_v18  }
 0x128   :  { %482 = vperm.xlu1 %701, %v361_v22  }
 0x12c   :  { %487 = vperm.xlu1 %701, %v362_v25  }
 0x130   :  { %492 = vperm.xlu1 %701, %v363_v26  }
 0x154   :  { %415 = vadd.xlane.f32.xlu1 %v406_v34 }
 0x193   :  { %v463_v37 = vpop.permute.xlu1 %462  ;;  %v458_v43 = vpop.permute.xlu0 %457 }
 0x194   :  { %v496_v47 = vsel %vm434_vm4, %v463_v37, 0.0  ;;  %v530_v48 = vsel %vm447_vm5, %v463_v37, 0.0  ;;  %v495_v49 = vsel %vm433_vm6, %v458_v43, 0.0  ;;  %v529_v50 = vsel %vm446_vm7, %v458_v43, 0.0 }
 0x195   :  { %v505_v55 = vsel %vm503_vm8, %v496_v47, 0.0  ;;  %v538_v56 = vsel %vm503_vm8, %v530_v48, 0.0  ;;  %v504_v57 = vsel %vm503_vm8, %v495_v49, 0.0  ;;  %v537_v58 = vsel %vm503_vm8, %v529_v50, 0.0  ;;  %v528_v47 = vld [vmem:[#allocation4] sm:$0x1] }
 0x196   :  { %v506_v0 = vadd.f32 %v505_v55, %v504_v57  ;;  %v539_v1 = vadd.f32 %v538_v56, %v537_v58  ;;  %vm452_vm4 = vcmp.eq.s32.totalorder %v371_v54, %v843_v40  ;;  %vm440_vm5 = vcmp.eq.s32.totalorder %v372_v13, %v838_v39 }
 0x197   :  { %v468_v42 = vpop.permute.xlu1 %467  ;;  %vm453_vm6 = vcmp.eq.s32.totalorder %v372_v13, %v843_v40 }
 0x198   :  { %v497_v52 = vsel %vm435_vm9, %v468_v42, 0.0  ;;  %v531_v53 = vsel %vm448_vm10, %v468_v42, 0.0 }
 0x199   :  { %v507_v62 = vsel %vm503_vm8, %v497_v52, 0.0  ;;  %v540_v63 = vsel %vm503_vm8, %v531_v53, 0.0 }
 0x19a   :  { %v508_v7 = vadd.f32 %v507_v62, %v506_v0  ;;  %v541_v8 = vadd.f32 %v540_v63, %v539_v1 }
 0x19b   :  { %v473_v46 = vpop.permute.xlu1 %472 }
 0x19c   :  { %v498_v60 = vsel %vm436_vm11, %v473_v46, 0.0  ;;  %v532_v61 = vsel %vm449_vm12, %v473_v46, 0.0  ;;  %v454_v46 = vld [vmem:[#allocation3] sm:$0x1] }
 0x19d   :  { %v509_v4 = vsel %vm503_vm8, %v498_v60, 0.0  ;;  %v542_v5 = vsel %vm503_vm8, %v532_v61, 0.0 }
 0x19e   :  { %v510_v14 = vadd.f32 %v509_v4, %v508_v7  ;;  %v543_v15 = vadd.f32 %v542_v5, %v541_v8 }
 0x19f   :  { %v478_v59 = vpop.permute.xlu1 %477 }
 0x1a0   :  { %v499_v2 = vsel %vm437_vm13, %v478_v59, 0.0  ;;  %v533_v3 = vsel %vm450_vm14, %v478_v59, 0.0 }
 0x1a1   :  { %v511_v11 = vsel %vm503_vm8, %v499_v2, 0.0  ;;  %v544_v12 = vsel %vm503_vm8, %v533_v3, 0.0  ;;  %v383_v2 = vld [vmem:[#allocation2] sm:$0x1] }
 0x1a2   :  { %v512_v19 = vadd.f32 %v511_v11, %v510_v14  ;;  %v545_v20 = vadd.f32 %v544_v12, %v543_v15 }
 0x1a3   :  { %v483_v6 = vpop.permute.xlu1 %482 }
 0x1a4   :  { %v500_v9 = vsel %vm438_vm15, %v483_v6, 0.0  ;;  %v534_v10 = vsel %vm451_vm0, %v483_v6, 0.0 }
 0x1a5   :  { %v513_v16 = vsel %vm503_vm8, %v500_v9, 0.0  ;;  %v546_v17 = vsel %vm503_vm8, %v534_v10, 0.0 }
 0x1a6   :  { %v514_v25 = vadd.f32 %v513_v16, %v512_v19  ;;  %v547_v26 = vadd.f32 %v546_v17, %v545_v20 }
 0x1a7   :  { %v488_v18 = vpop.permute.xlu1 %487 }
 0x1a8   :  { %v501_v21 = vsel %vm439_vm1, %v488_v18, 0.0  ;;  %v535_v22 = vsel %vm452_vm4, %v488_v18, 0.0 }
 0x1a9   :  { %v515_v23 = vsel %vm503_vm8, %v501_v21, 0.0  ;;  %v548_v24 = vsel %vm503_vm8, %v535_v22, 0.0 }
 0x1aa   :  { %v516_v28 = vadd.f32 %v515_v23, %v514_v25  ;;  %v549_v29 = vadd.f32 %v548_v24, %v547_v26 }
 0x1ab   :  { %v493_v27 = vpop.permute.xlu1 %492 }
 0x1ac   :  { %v502_v30 = vsel %vm440_vm5, %v493_v27, 0.0  ;;  %v536_v31 = vsel %vm453_vm6, %v493_v27, 0.0 }
 0x1ad   :  { %v517_v32 = vsel %vm503_vm8, %v502_v30, 0.0  ;;  %v550_v33 = vsel %vm503_vm8, %v536_v31, 0.0 }
 0x1ae   :  { %v518_v34 = vadd.f32 %v517_v32, %v516_v28  ;;  %v551_v35 = vadd.f32 %v550_v33, %v549_v29 }
 0x1b0   :  { %v519_v36 = vrot.slane %v518_v34, 4  ;;  %v552_v37 = vrot.slane %v551_v35, 4 }
 0x1b2   :  { %v520_v38 = vadd.f32 %v519_v36, %v518_v34  ;;  %v553_v41 = vadd.f32 %v552_v37, %v551_v35 }
 0x1b4   :  { %v521_v39 = vrot.slane %v520_v38, 2  ;;  %v554_v42 = vrot.slane %v553_v41, 2 }
 0x1b6   :  { %v522_v40 = vadd.f32 %v521_v39, %v520_v38  ;;  %v555_v43 = vadd.f32 %v554_v42, %v553_v41 }
 0x1b8   :  { %v523_v44 = vrot.slane %v522_v40, 1  ;;  %v556_v45 = vrot.slane %v555_v43, 1 }
 0x1ba   :  { %v524_v48 = vadd.f32 %v523_v44, %v522_v40  ;;  %v557_v49 = vadd.f32 %v556_v45, %v555_v43 }
 0x1bc   :  { %v525_v50 = vadd.f32 %v524_v48, %v454_v46  ;;  %v558_v51 = vadd.f32 %v557_v49, %v528_v47 }
 0x1be   :  { %527 = vst.msk [vmem:[#allocation3] sm:$0x1] %vm24_vm2, %v525_v50  ;;  %559 = vst.msk [vmem:[#allocation4] sm:$0x1] %vm24_vm2, %v558_v51 }
 0x1c5   :  { %v567_v52 = vld [vmem:[#allocation4] sm:$0x1]  ;;  %v568_v53 = vld [vmem:[#allocation3] sm:$0x1] }
 0x1c6   :  { %v569_v54 = vsub.f32 %v567_v52, %v568_v53 }
 0x1c8   :  { %v570_v55 = vmul.f32 0.5, %v569_v54 }
 0x1ca   :  { %v571_v56 = vadd.f32 1.0, %v570_v55 }
 0x1cc   :  { %v572_v57 = vmax.f32 %v571_v56, 0.0 }
 0x1ce   :  { %v573_v58 = vsel %vm24_vm2, %v572_v57, 0.0 }
 0x1cf   :  { %574 = vadd.xlane.f32.xlu0 %v573_v58 }
 0x1dd   :  { %v416_v59 = vpop.xlane.xlu1 %415 }
 0x1de   :  { %v417_v60 = vrot.slane %v416_v59, 4 }
 0x1e0   :  { %v418_v61 = vadd.f32 %v417_v60, %v416_v59 }
 0x1e2   :  { %v419_v62 = vrot.slane %v418_v61, 2 }
 0x1e4   :  { %v420_v63 = vadd.f32 %v419_v62, %v418_v61 }
 0x1e6   :  { %v421_v0 = vrot.slane %v420_v63, 1 }
 0x1e8   :  { %v422_v1 = vadd.f32 %v421_v0, %v420_v63 }
 0x1ea   :  { %691 = vpush %v422_v1 }
 0x21b   :  { %s692_s2 = spop %691 }
 0x21c   :  { %v424_v3 = vstv %s692_s2 }
 0x21d   :  { %v425_v4 = vadd.f32 %v424_v3, %v383_v2 }
 0x21f   :  { %427 = vst.msk [vmem:[#allocation2] sm:$0x1] %vm22_vm3, %v425_v4 }
 0x226   :  { %v563_v12 = vld [vmem:[#allocation2] sm:$0x1] }
 0x227   :  { %v565_v13 = vmul.f32 0.03125, %v563_v12 }
 0x229   :  { %v566_v14 = vsub.f32 1.0, %v565_v13 }
 0x22b   :  { %v586_v15 = vmul.f32 0.001, %v566_v14 }
 0x258   :  { %v575_v5 = vpop.xlane.xlu0 %574 }
 0x259   :  { %v576_v6 = vrot.slane %v575_v5, 4 }
 0x25b   :  { %v577_v7 = vadd.f32 %v576_v6, %v575_v5 }
 0x25d   :  { %v578_v8 = vrot.slane %v577_v7, 2 }
 0x25f   :  { %v579_v9 = vadd.f32 %v578_v8, %v577_v7 }
 0x261   :  { %v580_v10 = vrot.slane %v579_v9, 1 }
 0x263   :  { %v581_v11 = vadd.f32 %v580_v10, %v579_v9 }
 0x265   :  { %693 = vpush %v581_v11 }
 0x296   :  { %s694_s3 = spop %693 }
 0x297   :  { %s585_s19 = smul.f32 0.083333336, %s694_s3 }
 0x299   :  { %s587_s20 = smul.f32 0.5, %s585_s19 }
 0x29b   :  { %v588_v16 = vstv %s587_s20 }
 0x29c   :  { %v589_v17 = vadd.f32 %v588_v16, %v586_v15 }
 0x29e   :  { %590 = vst.msk [vmem:[#allocation5] sm:$0x1] %vm22_vm3, %v589_v17 }
 0x29f   :  { %731 = shalt.err (!%p728_p4)
}
 0x2a0   :  { %600 = dma.vmem_to_hbm [thread:$0]  %s598_s22, 16, %s895_s4, [#allocation6]  }
 0x2a1   :  { %740 = dma.done.wait [#allocation6], 16  }
 0x2a2   :  { %741 = vsyncadd [#allocation6], 4294967280 }
 0x2a3   :  { %604 = vsyncpa [#allocation6], 1 }

</bundles_post_ra>
